<compile_context>
chip_gen: v6e
topology: v6e:2x2x1
jax: 0.10.0
libtpu: 0.0.40
codegen_flags: <defaults>
</compile_context>

<pallas_src>
import numpy as np
import jax
import jax.numpy as jnp
from jax.experimental import pallas as pl
from jax.experimental.pallas import tpu as pltpu

# ----------------------------- problem sizes --------------------------------
NUM_NODES   = 256   # N : rows (batched up so the 128-row blocks are full, per feedback)
INPUT_DIM   = 32    # input_dim for nn.Linear(input_dim, 1)
NUM_CENTERS = 32    # num_centers (RBF centers)
BLOCK_ROWS  = 128   # row tile per grid step


# ----------------------------- Pallas kernel --------------------------------
def _rbfnn_kernel(x_ref, pos_ref, w1_ref, b1_ref, ct_ref, csq_ref, iw2_ref,
                  w2_ref, wp_ref, bo_ref, o_ref):
    """Fused RBFNN forward for one block of nodes (everything resident in VMEM)."""
    x   = x_ref[...]                                                    # [B, D]
    pos = pos_ref[...]                                                  # [B, 3]

    # x1 = self.x1(x)
    x1 = jnp.dot(x, w1_ref[...], preferred_element_type=jnp.float32) + b1_ref[...]   # [B, 1]

    # gaussian_rbf(pos): ||p - c|| via ||p||^2 + ||c||^2 - 2 p.c  (centers pre-transposed)
    pn = jnp.sum(pos * pos, axis=1, keepdims=True)                                    # [B, 1]
    d2 = pn + csq_ref[...] - 2.0 * jnp.dot(pos, ct_ref[...],
                                           preferred_element_type=jnp.float32)        # [B, C]
    dist = jnp.sqrt(jnp.maximum(d2, 0.0))
    rbf = jnp.exp(-dist * iw2_ref[...])            # iw2 = 1/(2*widths^2) precomputed  # [B, C]

    # mul_output + rbf_output == rbf * (x1 + 1)
    t = rbf * (x1 + 1.0)                                                               # [B, C]

    # x2(t) + pos(rbf) + (b_x2 + b_pos), then LeakyReLU(0.2)
    h = (jnp.dot(t,   w2_ref[...], preferred_element_type=jnp.float32)
         + jnp.dot(rbf, wp_ref[...], preferred_element_type=jnp.float32)
         + bo_ref[...])                                                                # [B, 1]
    o_ref[...] = jnp.where(h > 0, h, 0.2 * h)


def rbfnn_forward(params, x, pos, *, block_rows=BLOCK_ROWS):
    """Single-launch fused RBFNN forward.  x:[N,D], pos:[N,3] -> [N,1]."""
    N, D = x.shape
    C = params['centers'].shape[0]
    bm = block_rows if N % block_rows == 0 else N
    grid = (N // bm,)

    # Host-side precompute hoisted out of the kernel (perf feedback):
    centers_t = params['centers'].T.astype(jnp.float32)                    # [3, C]
    csq = jnp.sum(params['centers'] ** 2, axis=-1)[None, :].astype(jnp.float32)   # [1, C]
    inv_2w2 = (1.0 / (2.0 * params['widths'] ** 2))[None, :].astype(jnp.float32)  # [1, C]
    b_out = (params['b2'] + params['bp']).reshape(1, 1).astype(jnp.float32)       # [1, 1]

    rep = lambda shp: pl.BlockSpec(shp, lambda i: (0, 0))   # replicated (weight) block

    return pl.pallas_call(
        _rbfnn_kernel,
        grid=grid,
        in_specs=[pl.BlockSpec((bm, D), lambda i: (i, 0)),   # x  (row-tiled)
                  pl.BlockSpec((bm, 3), lambda i: (i, 0)),   # pos (row-tiled)
                  rep((D, 1)), rep((1, 1)),                  # W1, b1
                  rep((3, C)), rep((1, C)), rep((1, C)),     # centers^T, ||c||^2, 1/(2w^2)
                  rep((C, 1)), rep((C, 1)), rep((1, 1))],    # W2, Wpos, (b2+bpos)
        out_specs=pl.BlockSpec((bm, 1), lambda i: (i, 0)),
        out_shape=jax.ShapeDtypeStruct((N, 1), jnp.float32),
        compiler_params=pltpu.CompilerParams(dimension_semantics=("parallel",)),
    )(x.astype(jnp.float32), pos.astype(jnp.float32),
      params['W1'], params['b1'].reshape(1, 1),
      centers_t, csq, inv_2w2,
      params['W2'], params['Wp'], b_out)


# ----------------------------- pure-JAX reference ----------------------------
def rbfnn_reference(params, x, pos):
    """Literal transcription of RBFNN.forward (PyTorch semantics) for verification."""
    x1 = x @ params['W1'] + params['b1']                                   # [N, 1]
    diff = pos[:, None, :] - params['centers'][None, :, :]
    dist = jnp.sqrt(jnp.sum(diff ** 2, axis=2))                            # [N, C]
    rbf = jnp.exp(-dist / (2.0 * params['widths'] ** 2))                   # [N, C]
    x2 = (rbf * x1 + rbf) @ params['W2'] + params['b2']                    # [N, 1]
    pos1 = rbf @ params['Wp'] + params['bp']                               # [N, 1]
    h = x2 + pos1
    return jnp.where(h > 0, h, 0.2 * h)


# ----------------------------- parameter init --------------------------------
def init_rbfnn_params(key, input_dim, num_centers):
    ks = jax.random.split(key, 7)

    def lin(kw, kb, fan_in, shape_w):
        bound = 1.0 / np.sqrt(fan_in)              # PyTorch nn.Linear default init
        W = jax.random.uniform(kw, shape_w, jnp.float32, -bound, bound)
        b = jax.random.uniform(kb, (1,), jnp.float32, -bound, bound)
        return W, b

    W1, b1 = lin(ks[0], ks[1], input_dim, (input_dim, 1))
    W2, b2 = lin(ks[2], ks[3], num_centers, (num_centers, 1))
    Wp, bp = lin(ks[4], ks[5], num_centers, (num_centers, 1))
    return {'centers': jax.random.normal(ks[6], (num_centers, 3), jnp.float32),
            'widths': jnp.ones((num_centers,), jnp.float32),
            'W1': W1, 'b1': b1, 'W2': W2, 'b2': b2, 'Wp': Wp, 'bp': bp}


# ----------------------------- main ------------------------------------------
if __name__ == "__main__":
    root = jax.random.PRNGKey(0)
    kp, kx, kpos = jax.random.split(root, 3)

    params = init_rbfnn_params(kp, INPUT_DIM, NUM_CENTERS)
    x = jax.random.normal(kx, (NUM_NODES, INPUT_DIM), jnp.float32)
    pos = jax.random.normal(kpos, (NUM_NODES, 3), jnp.float32) * 2.0

    out = jax.block_until_ready(rbfnn_forward(params, x, pos))
    ref = jax.block_until_ready(rbfnn_reference(params, x, pos))

    assert out.shape == (NUM_NODES, 1)
    assert bool(jnp.all(jnp.isfinite(out)))
    max_err = float(jnp.max(jnp.abs(out - ref)))
    assert max_err < 1e-3, f"mismatch vs reference: max abs err = {max_err}"
    print("KERNEL_OK")
</pallas_src>

<mosaic_0001>
module attributes {stable_mosaic.version = 11 : i64} {
  func.func @_rbfnn_kernel(%arg0: i32, %arg1: memref<128x32xf32, #tpu.memory_space<vmem>>, %arg2: memref<128x3xf32, #tpu.memory_space<vmem>>, %arg3: memref<32x1xf32, #tpu.memory_space<vmem>>, %arg4: memref<1x1xf32, #tpu.memory_space<vmem>>, %arg5: memref<3x32xf32, #tpu.memory_space<vmem>>, %arg6: memref<1x32xf32, #tpu.memory_space<vmem>>, %arg7: memref<1x32xf32, #tpu.memory_space<vmem>>, %arg8: memref<32x1xf32, #tpu.memory_space<vmem>>, %arg9: memref<32x1xf32, #tpu.memory_space<vmem>>, %arg10: memref<1x1xf32, #tpu.memory_space<vmem>>, %arg11: memref<128x1xf32, #tpu.memory_space<vmem>>) attributes {dimension_semantics = [#tpu.dimension_semantics<parallel>], iteration_bounds = array<i64: 2>, scalar_prefetch = 0 : i64, scratch_operands = 0 : i64, tpu.core_type = #tpu.core_type<tc>, window_params = [{transform_indices = @transform_0, window_bounds = array<i64: 128, 32>}, {transform_indices = @transform_1, window_bounds = array<i64: 128, 3>}, {pipeline_mode = #tpu.pipeline_mode<synchronous>, transform_indices = @transform_2, window_bounds = array<i64: 32, 1>}, {pipeline_mode = #tpu.pipeline_mode<synchronous>, transform_indices = @transform_3, window_bounds = array<i64: 1, 1>}, {pipeline_mode = #tpu.pipeline_mode<synchronous>, transform_indices = @transform_4, window_bounds = array<i64: 3, 32>}, {pipeline_mode = #tpu.pipeline_mode<synchronous>, transform_indices = @transform_5, window_bounds = array<i64: 1, 32>}, {pipeline_mode = #tpu.pipeline_mode<synchronous>, transform_indices = @transform_6, window_bounds = array<i64: 1, 32>}, {pipeline_mode = #tpu.pipeline_mode<synchronous>, transform_indices = @transform_7, window_bounds = array<i64: 32, 1>}, {pipeline_mode = #tpu.pipeline_mode<synchronous>, transform_indices = @transform_8, window_bounds = array<i64: 32, 1>}, {pipeline_mode = #tpu.pipeline_mode<synchronous>, transform_indices = @transform_9, window_bounds = array<i64: 1, 1>}, {transform_indices = @transform_10, window_bounds = array<i64: 128, 1>}]} {
    %c0 = arith.constant 0 : index
    %c0_0 = arith.constant 0 : index
    %0 = vector.load %arg1[%c0, %c0_0] : memref<128x32xf32, #tpu.memory_space<vmem>>, vector<128x32xf32>
    %c0_1 = arith.constant 0 : index
    %c0_2 = arith.constant 0 : index
    %1 = vector.load %arg2[%c0_1, %c0_2] : memref<128x3xf32, #tpu.memory_space<vmem>>, vector<128x3xf32>
    %c0_3 = arith.constant 0 : index
    %c0_4 = arith.constant 0 : index
    %2 = vector.load %arg3[%c0_3, %c0_4] : memref<32x1xf32, #tpu.memory_space<vmem>>, vector<32x1xf32>
    %cst = arith.constant dense<0.000000e+00> : vector<128x1xf32>
    %3 = tpu.matmul %0, %2, %cst {dimension_numbers = #tpu.dot_dimension_numbers<[1], [0], [0], [1], [0, 0, 1, 1], [], []>} : vector<128x32xf32>, vector<32x1xf32>, vector<128x1xf32> -> vector<128x1xf32>
    %c0_5 = arith.constant 0 : index
    %c0_6 = arith.constant 0 : index
    %4 = vector.load %arg4[%c0_5, %c0_6] : memref<1x1xf32, #tpu.memory_space<vmem>>, vector<1x1xf32>
    %5 = vector.broadcast %4 : vector<1x1xf32> to vector<128x1xf32>
    %6 = arith.addf %3, %5 : vector<128x1xf32>
    %7 = arith.mulf %1, %1 : vector<128x3xf32>
    %cst_7 = arith.constant dense<0.000000e+00> : vector<128xf32>
    %8 = vector.multi_reduction <add>, %7, %cst_7 [1] : vector<128x3xf32> to vector<128xf32>
    %9 = vector.shape_cast %8 : vector<128xf32> to vector<128x1xf32>
    %c0_8 = arith.constant 0 : index
    %c0_9 = arith.constant 0 : index
    %10 = vector.load %arg6[%c0_8, %c0_9] : memref<1x32xf32, #tpu.memory_space<vmem>>, vector<1x32xf32>
    %11 = vector.broadcast %9 : vector<128x1xf32> to vector<128x32xf32>
    %12 = vector.broadcast %10 : vector<1x32xf32> to vector<128x32xf32>
    %13 = arith.addf %11, %12 : vector<128x32xf32>
    %c0_10 = arith.constant 0 : index
    %c0_11 = arith.constant 0 : index
    %14 = vector.load %arg5[%c0_10, %c0_11] : memref<3x32xf32, #tpu.memory_space<vmem>>, vector<3x32xf32>
    %cst_12 = arith.constant dense<0.000000e+00> : vector<128x32xf32>
    %15 = tpu.matmul %1, %14, %cst_12 {dimension_numbers = #tpu.dot_dimension_numbers<[1], [0], [0], [1], [0, 0, 1, 1], [], []>} : vector<128x3xf32>, vector<3x32xf32>, vector<128x32xf32> -> vector<128x32xf32>
    %cst_13 = arith.constant 2.000000e+00 : f32
    %16 = vector.broadcast %cst_13 : f32 to vector<128x32xf32>
    %17 = arith.mulf %16, %15 : vector<128x32xf32>
    %18 = arith.subf %13, %17 : vector<128x32xf32>
    %cst_14 = arith.constant 0.000000e+00 : f32
    %19 = vector.broadcast %cst_14 : f32 to vector<128x32xf32>
    %20 = arith.maximumf %18, %19 : vector<128x32xf32>
    %21 = math.sqrt %20 : vector<128x32xf32>
    %cst_15 = arith.constant 0.000000e+00 : f32
    %22 = vector.broadcast %cst_15 : f32 to vector<128x32xf32>
    %23 = arith.subf %22, %21 : vector<128x32xf32>
    %c0_16 = arith.constant 0 : index
    %c0_17 = arith.constant 0 : index
    %24 = vector.load %arg7[%c0_16, %c0_17] : memref<1x32xf32, #tpu.memory_space<vmem>>, vector<1x32xf32>
    %25 = vector.broadcast %24 : vector<1x32xf32> to vector<128x32xf32>
    %26 = arith.mulf %23, %25 : vector<128x32xf32>
    %27 = math.exp %26 : vector<128x32xf32>
    %cst_18 = arith.constant 1.000000e+00 : f32
    %28 = vector.broadcast %cst_18 : f32 to vector<128x1xf32>
    %29 = arith.addf %6, %28 : vector<128x1xf32>
    %30 = vector.broadcast %29 : vector<128x1xf32> to vector<128x32xf32>
    %31 = arith.mulf %27, %30 : vector<128x32xf32>
    %c0_19 = arith.constant 0 : index
    %c0_20 = arith.constant 0 : index
    %32 = vector.load %arg8[%c0_19, %c0_20] : memref<32x1xf32, #tpu.memory_space<vmem>>, vector<32x1xf32>
    %cst_21 = arith.constant dense<0.000000e+00> : vector<128x1xf32>
    %33 = tpu.matmul %31, %32, %cst_21 {dimension_numbers = #tpu.dot_dimension_numbers<[1], [0], [0], [1], [0, 0, 1, 1], [], []>} : vector<128x32xf32>, vector<32x1xf32>, vector<128x1xf32> -> vector<128x1xf32>
    %c0_22 = arith.constant 0 : index
    %c0_23 = arith.constant 0 : index
    %34 = vector.load %arg9[%c0_22, %c0_23] : memref<32x1xf32, #tpu.memory_space<vmem>>, vector<32x1xf32>
    %cst_24 = arith.constant dense<0.000000e+00> : vector<128x1xf32>
    %35 = tpu.matmul %27, %34, %cst_24 {dimension_numbers = #tpu.dot_dimension_numbers<[1], [0], [0], [1], [0, 0, 1, 1], [], []>} : vector<128x32xf32>, vector<32x1xf32>, vector<128x1xf32> -> vector<128x1xf32>
    %36 = arith.addf %33, %35 : vector<128x1xf32>
    %c0_25 = arith.constant 0 : index
    %c0_26 = arith.constant 0 : index
    %37 = vector.load %arg10[%c0_25, %c0_26] : memref<1x1xf32, #tpu.memory_space<vmem>>, vector<1x1xf32>
    %38 = vector.broadcast %37 : vector<1x1xf32> to vector<128x1xf32>
    %39 = arith.addf %36, %38 : vector<128x1xf32>
    %cst_27 = arith.constant 0.000000e+00 : f32
    %40 = vector.broadcast %cst_27 : f32 to vector<128x1xf32>
    %41 = arith.cmpf ogt, %39, %40 : vector<128x1xf32>
    %cst_28 = arith.constant 2.000000e-01 : f32
    %42 = vector.broadcast %cst_28 : f32 to vector<128x1xf32>
    %43 = arith.mulf %42, %39 : vector<128x1xf32>
    %44 = arith.select %41, %39, %43 : vector<128x1xi1>, vector<128x1xf32>
    %c0_29 = arith.constant 0 : index
    %c0_30 = arith.constant 0 : index
    %45 = vector.load %arg11[%c0_29, %c0_30] : memref<128x1xf32, #tpu.memory_space<vmem>>, vector<128x1xf32>
    tpu.vector_store %arg11[%c0_29, %c0_30], %44 {strides = array<i32>} : memref<128x1xf32, #tpu.memory_space<vmem>>, vector<128x1xf32>,
    return
  }
  func.func @transform_0(%arg0: i32) -> (i32, i32) {
    %c0_i32 = arith.constant 0 : i32
    %c0_i32_0 = arith.constant 0 : i32
    return %arg0, %c0_i32 : i32, i32
  }
  func.func @transform_1(%arg0: i32) -> (i32, i32) {
    %c0_i32 = arith.constant 0 : i32
    %c0_i32_0 = arith.constant 0 : i32
    return %arg0, %c0_i32 : i32, i32
  }
  func.func @transform_2(%arg0: i32) -> (i32, i32) {
    %c0_i32 = arith.constant 0 : i32
    %c0_i32_0 = arith.constant 0 : i32
    %c0_i32_1 = arith.constant 0 : i32
    return %c0_i32, %c0_i32_0 : i32, i32
  }
  func.func @transform_3(%arg0: i32) -> (i32, i32) {
    %c0_i32 = arith.constant 0 : i32
    %c0_i32_0 = arith.constant 0 : i32
    %c0_i32_1 = arith.constant 0 : i32
    return %c0_i32, %c0_i32_0 : i32, i32
  }
  func.func @transform_4(%arg0: i32) -> (i32, i32) {
    %c0_i32 = arith.constant 0 : i32
    %c0_i32_0 = arith.constant 0 : i32
    %c0_i32_1 = arith.constant 0 : i32
    return %c0_i32, %c0_i32_0 : i32, i32
  }
  func.func @transform_5(%arg0: i32) -> (i32, i32) {
    %c0_i32 = arith.constant 0 : i32
    %c0_i32_0 = arith.constant 0 : i32
    %c0_i32_1 = arith.constant 0 : i32
    return %c0_i32, %c0_i32_0 : i32, i32
  }
  func.func @transform_6(%arg0: i32) -> (i32, i32) {
    %c0_i32 = arith.constant 0 : i32
    %c0_i32_0 = arith.constant 0 : i32
    %c0_i32_1 = arith.constant 0 : i32
    return %c0_i32, %c0_i32_0 : i32, i32
  }
  func.func @transform_7(%arg0: i32) -> (i32, i32) {
    %c0_i32 = arith.constant 0 : i32
    %c0_i32_0 = arith.constant 0 : i32
    %c0_i32_1 = arith.constant 0 : i32
    return %c0_i32, %c0_i32_0 : i32, i32
  }
  func.func @transform_8(%arg0: i32) -> (i32, i32) {
    %c0_i32 = arith.constant 0 : i32
    %c0_i32_0 = arith.constant 0 : i32
    %c0_i32_1 = arith.constant 0 : i32
    return %c0_i32, %c0_i32_0 : i32, i32
  }
  func.func @transform_9(%arg0: i32) -> (i32, i32) {
    %c0_i32 = arith.constant 0 : i32
    %c0_i32_0 = arith.constant 0 : i32
    %c0_i32_1 = arith.constant 0 : i32
    return %c0_i32, %c0_i32_0 : i32, i32
  }
  func.func @transform_10(%arg0: i32) -> (i32, i32) {
    %c0_i32 = arith.constant 0 : i32
    %c0_i32_0 = arith.constant 0 : i32
    return %arg0, %c0_i32 : i32, i32
  }
}

</mosaic_0001>

<bundles_post_ra>
// kernel: tpu_custom_call.1
= control target key start
LH: loop header
LB: loop body
LE: loop exit
PB: predicated region body
PF: predicated region fallthrough
CT: control target
= control target key end

     0   :  { %s2231_s17 = smov 0   ;;  %s2762_s0 = inlined_call_operand.vmem [shape: f32[256,32], index: 0, kind: input, shape index: {}]   ;;  %s2763_s1 = inlined_call_operand.vmem [shape: f32[256,3], index: 1, kind: input, shape index: {}]   ;;  %s2764_s2 = inlined_call_operand.vmem [shape: f32[32,1], index: 2, kind: input, shape index: {}]   ;;  %s2765_s3 = inlined_call_operand.<no memory space> [shape: f32[1,1], index: 3, kind: input, shape index: {}]   ;;  %s2766_s4 = inlined_call_operand.vmem [shape: f32[3,32], index: 4, kind: input, shape index: {}]   ;;  %s2767_s5 = inlined_call_operand.vmem [shape: f32[1,32], index: 5, kind: input, shape index: {}]   ;;  %s2768_s6 = inlined_call_operand.vmem [shape: f32[1,32], index: 6, kind: input, shape index: {}]   ;;  %s2769_s7 = inlined_call_operand.vmem [shape: f32[32,1], index: 7, kind: input, shape index: {}]   ;;  %s2770_s8 = inlined_call_operand.vmem [shape: f32[32,1], index: 8, kind: input, shape index: {}]   ;;  %s2771_s10 = inlined_call_operand.vmem [shape: f32[256,1], index: 10, kind: output, shape index: {}]   ;;  %s2772_s9 = inlined_call_operand.<no memory space> [shape: f32[1,1], index: 9, kind: input, shape index: {}]  }
   0x1   :  { %v15_v0 = vstv %s2765_s3  ;;  %v17_v1 = vstv %s2772_s9 }
   0x2   :  { %16 = vst [vmem:[#allocation2] sm:$0x1] %v15_v0  ;;  %18 = vst [vmem:[#allocation3] sm:$0x1] %v17_v1 }
   0x3 LB: > { %s1805_s18 = sadd.s32 4294967295, %s2167_s17   ;;  %p1809_p0 = scmp.ge.s32.totalorder %s2167_s17, 1  ;;  %s2167_s17 = sphi %s2231_s17, %s24_s17  }
   0x4   : > { %p328_p1 = scmp.lt.s32.totalorder %s2167_s17, 3 }
   0x6   : > { %p329_p2 = pnand %p1809_p0, %p328_p1 }
   0x7   : > { %s1810_s21 = sshll.u32 (!%p329_p2), %s1805_s18, 4 }
   0x8   : > { %332 = sbr.rel (%p329_p2) target bundleno = 589 (0x24d), region = 60  ;;  %p372_p3 = scmp.lt.s32.totalorder (!%p329_p2), %s1810_s21, 31 }
   0xd   : > { %v424_v2 = vld [vmem:[%s2764_s2 + $0x18] sm:$0xff]  ;;  %v423_v3 = vld [vmem:[%s2764_s2 + $0x10] sm:$0xff]  ;;  %vm763_vm0 = vcmask 1042432   ;;  %v714_v4 = vld [vmem:[%s2766_s4] sm:$0x7]  ;;  %s2774_s21 = smov (!%p372_p3, %s1810_s21), 31 }
   0xe   : > { %1964 = vmatprep.subr.mxu0 %v424_v2  ;;  %v422_v5 = vld [vmem:[%s2764_s2 + $0x8] sm:$0xff]  ;;  %1996 = vmatprep.subr.msk.mxu1 %vm763_vm0, %v714_v4  ;;  %v421_v6 = vld [vmem:[%s2764_s2] sm:$0xff]  ;;  %s2254_s28 = sshll.u32 %s2774_s21, 3  ;;  %vm432_vm1 = vcmask 261120   ;;  %vm642_vm2 = vcmask 23552  }
   0xf   : > { %1965 = vmatpush3.msra.mxu0 %v424_v2  ;;  %1997 = vmatpush3.msk.msra.mxu1 %vm763_vm0, %v714_v4  ;;  %s2260_s11 = scalar_lea.vmem %s2762_s0, %s2254_s28  ;;  %s2271_s14 = scalar_lea.vmem %s2763_s1, %s2254_s28 }
  0x10   : > { %1966 = vmatprep.subr.mxu0 %v423_v3  ;;  %v389_v7 = vld [vmem:[%s2260_s11] sm:$0xff]  ;;  %v390_v8 = vld [vmem:[%s2260_s11 + $0x8] sm:$0xff]  ;;  %v391_v9 = vld [vmem:[%s2260_s11 + $0x10] sm:$0xff]  ;;  %s2710_s18 = scalar_lea.vmem %s2771_s10, %s2254_s28 }
  0x11   : > { %1967 = vmatpush3.msra.mxu0 %v423_v3  ;;  %1972 = vmatprep.mubr.msk.f32.mxu0 %vm432_vm1, %v389_v7  ;;  %v392_v10 = vld [vmem:[%s2260_s11 + $0x18] sm:$0xff]  ;;  %v393_v11 = vld [vmem:[%s2260_s11 + $0x20] sm:$0xff]  ;;  %v406_v13 = vld [vmem:[%s2271_s14 + $0x8] sm:$0xff]  ;;  %v2169_v7 = vmov 0  }
  0x12   : > { %1968 = vmatprep.subr.mxu0 %v422_v5  ;;  %v405_v12 = vld [vmem:[%s2271_s14] sm:$0xff]  ;;  %v407_v15 = vld [vmem:[%s2271_s14 + $0x10] sm:$0xff]  ;;  %v408_v16 = vld [vmem:[%s2271_s14 + $0x18] sm:$0xff]  ;;  %v627_v17 = vmul.f32 %v406_v13, %v406_v13  ;;  %2096 = vset.pattern.permute.xlu1 %v2169_v7 }
  0x13   : > { %1969 = vmatpush3.msra.mxu0 %v422_v5  ;;  %v626_v14 = vmul.f32 %v405_v12, %v405_v12  ;;  %1998 = vmatprep.mubr.msk.f32.mxu1 %vm642_vm2, %v405_v12  ;;  %v394_v18 = vld [vmem:[%s2260_s11 + $0x28] sm:$0xff]  ;;  %v628_v19 = vmul.f32 %v407_v15, %v407_v15  ;;  %v629_v20 = vmul.f32 %v408_v16, %v408_v16  ;;  %v395_v21 = vld [vmem:[%s2260_s11 + $0x30] sm:$0xff]  ;;  %v409_v23 = vld [vmem:[%s2271_s14 + $0x20] sm:$0xff] }
  0x14   : > { %1970 = vmatprep.subr.mxu0 %v421_v6  ;;  %1999 = vmatmul.mubr.msk.f32.vlgmr.msra.gmra.mxu1 %vm642_vm2, %v406_v13  ;;  %v410_v25 = vld [vmem:[%s2271_s14 + $0x28] sm:$0xff]  ;;  %v646_v26 = vsel %vm642_vm2, %v627_v17, 0.0  ;;  %v630_v27 = vmul.f32 %v409_v23, %v409_v23  ;;  %v396_v28 = vld [vmem:[%s2260_s11 + $0x38] sm:$0xff]  ;;  %v397_v31 = vld [vmem:[%s2260_s11 + $0x40] sm:$0xff] }
  0x15   : > { %1971 = vmatpush3.msra.mxu0 %v421_v6  ;;  %2001 = vmatprep.mubr.msk.f32.mxu1 %vm642_vm2, %v407_v15  ;;  %v643_v22 = vsel %vm642_vm2, %v626_v14, 0.0  ;;  %v649_v24 = vsel %vm642_vm2, %v628_v19, 0.0  ;;  %v652_v29 = vsel %vm642_vm2, %v629_v20, 0.0  ;;  %v631_v30 = vmul.f32 %v410_v25, %v410_v25  ;;  %v411_v32 = vld [vmem:[%s2271_s14 + $0x30] sm:$0xff]  ;;  %v412_v33 = vld [vmem:[%s2271_s14 + $0x38] sm:$0xff]  ;;  %v398_v36 = vld [vmem:[%s2260_s11 + $0x48] sm:$0xff] }
  0x16   : > { %1973 = vmatmul.mubr.msk.f32.vlgmr.msra.gmra.mxu0 %vm432_vm1, %v390_v8  ;;  %644 = vadd.xlane.f32.xlu0 %v643_v22  ;;  %v655_v34 = vsel %vm642_vm2, %v630_v27, 0.0  ;;  %v632_v35 = vmul.f32 %v411_v32, %v411_v32  ;;  %v633_v38 = vmul.f32 %v412_v33, %v412_v33  ;;  %v399_v39 = vld [vmem:[%s2260_s11 + $0x50] sm:$0xff]  ;;  %v413_v40 = vld [vmem:[%s2271_s14 + $0x40] sm:$0xff]  ;;  %v414_v41 = vld [vmem:[%s2271_s14 + $0x48] sm:$0xff] }
  0x17   : > { %1975 = vmatprep.mubr.msk.f32.mxu0 %vm432_vm1, %v391_v9  ;;  %650 = vadd.xlane.f32.xlu1 %v649_v24  ;;  %v658_v37 = vsel %vm642_vm2, %v631_v30, 0.0  ;;  %v634_v43 = vmul.f32 %v413_v40, %v413_v40  ;;  %v400_v44 = vld [vmem:[%s2260_s11 + $0x58] sm:$0xff]  ;;  %v635_v46 = vmul.f32 %v414_v41, %v414_v41  ;;  %v401_v47 = vld [vmem:[%s2260_s11 + $0x60] sm:$0xff]  ;;  %v415_v48 = vld [vmem:[%s2271_s14 + $0x50] sm:$0xff] }
  0x18   : > { %2002 = vmatmul.mubr.msk.f32.gmra.mxu1 %vm642_vm2, %v408_v16  ;;  %v661_v42 = vsel %vm642_vm2, %v632_v35, 0.0  ;;  %v664_v45 = vsel %vm642_vm2, %v633_v38, 0.0  ;;  %v416_v49 = vld [vmem:[%s2271_s14 + $0x58] sm:$0xff]  ;;  %v636_v51 = vmul.f32 %v415_v48, %v415_v48  ;;  %v402_v52 = vld [vmem:[%s2260_s11 + $0x68] sm:$0xff]  ;;  %v403_v55 = vld [vmem:[%s2260_s11 + $0x70] sm:$0xff]  ;;  %2095 = vset.pattern.permute.xlu0 %v2169_v7 }
  0x19   : > { %2004 = vmatprep.mubr.msk.f32.mxu1 %vm642_vm2, %v409_v23  ;;  %v667_v50 = vsel %vm642_vm2, %v634_v43, 0.0  ;;  %v670_v53 = vsel %vm642_vm2, %v635_v46, 0.0  ;;  %v637_v54 = vmul.f32 %v416_v49, %v416_v49  ;;  %v417_v56 = vld [vmem:[%s2271_s14 + $0x60] sm:$0xff]  ;;  %v418_v57 = vld [vmem:[%s2271_s14 + $0x68] sm:$0xff]  ;;  %v404_v60 = vld [vmem:[%s2260_s11 + $0x78] sm:$0xff] }
  0x1a   : > { %1976 = vmatmul.mubr.msk.f32.gmra.mxu0 %vm432_vm1, %v392_v10  ;;  %647 = vadd.xlane.f32.xlu0 %v646_v26  ;;  %v673_v58 = vsel %vm642_vm2, %v636_v51, 0.0  ;;  %v638_v59 = vmul.f32 %v417_v56, %v417_v56  ;;  %v639_v62 = vmul.f32 %v418_v57, %v418_v57  ;;  %v419_v63 = vld [vmem:[%s2271_s14 + $0x70] sm:$0xff]  ;;  %v420_v0 = vld [vmem:[%s2271_s14 + $0x78] sm:$0xff]  ;;  %v1260_v12 = vld [vmem:[%s2770_s8 + $0x8] sm:$0xff] }
  0x1b   : > { %1978 = vmatprep.mubr.msk.f32.mxu0 %vm432_vm1, %v393_v11  ;;  %653 = vadd.xlane.f32.xlu1 %v652_v29  ;;  %v676_v61 = vsel %vm642_vm2, %v637_v54, 0.0  ;;  %v640_v2 = vmul.f32 %v419_v63, %v419_v63  ;;  %v641_v4 = vmul.f32 %v420_v0, %v420_v0  ;;  %v1262_v8 = vld [vmem:[%s2770_s8 + $0x18] sm:$0xff]  ;;  %v1261_v10 = vld [vmem:[%s2770_s8 + $0x10] sm:$0xff]  ;;  %v1256_v13 = vld [vmem:[%s2769_s7 + $0x8] sm:$0xff] }
  0x1c   : > { %2005 = vmatmul.mubr.msk.f32.gmra.mxu1 %vm642_vm2, %v410_v25  ;;  %v679_v1 = vsel %vm642_vm2, %v638_v59, 0.0  ;;  %v682_v3 = vsel %vm642_vm2, %v639_v62, 0.0  ;;  %v1258_v9 = vld [vmem:[%s2769_s7 + $0x18] sm:$0xff]  ;;  %2022 = vmatprep.subr.mxu1 %v1262_v8  ;;  %v1257_v11 = vld [vmem:[%s2769_s7 + $0x10] sm:$0xff]  ;;  %v1259_v14 = vld [vmem:[%s2770_s8] sm:$0xff] }
  0x1d   : > { %2007 = vmatprep.mubr.msk.f32.mxu1 %vm642_vm2, %v411_v32  ;;  %v685_v5 = vsel %vm642_vm2, %v640_v2, 0.0  ;;  %v688_v6 = vsel %vm642_vm2, %v641_v4, 0.0  ;;  %2054 = vmatprep.subr.mxu0 %v1258_v9  ;;  %v2369_v23 = vld [vmem:[#allocation2] ss:$0 sm:$0xff] }
  0x1e   : > { %1979 = vmatmul.mubr.msk.f32.gmra.mxu0 %vm432_vm1, %v394_v18  ;;  %656 = vadd.xlane.f32.xlu0 %v655_v34  ;;  %v2375_v27 = vld [vmem:[%s2767_s5] ss:$0 sm:$0xff] }
  0x1f   : > { %1981 = vmatprep.mubr.msk.f32.mxu0 %vm432_vm1, %v395_v21  ;;  %659 = vadd.xlane.f32.xlu1 %v658_v37  ;;  %v1255_v32 = vld [vmem:[%s2769_s7] sm:$0xff] }
  0x20   : > { %2008 = vmatmul.mubr.msk.f32.gmra.mxu1 %vm642_vm2, %v412_v33  ;;  %2055 = vmatpush3.msra.mxu0 %v1258_v9 }
  0x21   : > { %2010 = vmatprep.mubr.msk.f32.mxu1 %vm642_vm2, %v413_v40  ;;  %2023 = vmatpush3.msra.mxu1 %v1262_v8 }
  0x22   : > { %1982 = vmatmul.mubr.msk.f32.gmra.mxu0 %vm432_vm1, %v396_v28  ;;  %662 = vadd.xlane.f32.xlu0 %v661_v42 }
  0x23   : > { %1984 = vmatprep.mubr.msk.f32.mxu0 %vm432_vm1, %v397_v31  ;;  %665 = vadd.xlane.f32.xlu1 %v664_v45 }
  0x24   : > { %2011 = vmatmul.mubr.msk.f32.gmra.mxu1 %vm642_vm2, %v414_v41  ;;  %2024 = vmatprep.subr.mxu1 %v1261_v10 }
  0x25   : > { %2013 = vmatprep.mubr.msk.f32.mxu1 %vm642_vm2, %v415_v48  ;;  %2056 = vmatprep.subr.mxu0 %v1257_v11 }
  0x26   : > { %1985 = vmatmul.mubr.msk.f32.gmra.mxu0 %vm432_vm1, %v398_v36  ;;  %668 = vadd.xlane.f32.xlu0 %v667_v50 }
  0x27   : > { %1987 = vmatprep.mubr.msk.f32.mxu0 %vm432_vm1, %v399_v39  ;;  %671 = vadd.xlane.f32.xlu1 %v670_v53 }
  0x28   : > { %2014 = vmatmul.mubr.msk.f32.gmra.mxu1 %vm642_vm2, %v416_v49  ;;  %2057 = vmatpush3.msra.mxu0 %v1257_v11 }
  0x29   : > { %2016 = vmatprep.mubr.msk.f32.mxu1 %vm642_vm2, %v417_v56  ;;  %2025 = vmatpush3.msra.mxu1 %v1261_v10 }
  0x2a   : > { %1988 = vmatmul.mubr.msk.f32.gmra.mxu0 %vm432_vm1, %v400_v44  ;;  %674 = vadd.xlane.f32.xlu0 %v673_v58 }
  0x2b   : > { %1990 = vmatprep.mubr.msk.f32.mxu0 %vm432_vm1, %v401_v47  ;;  %677 = vadd.xlane.f32.xlu1 %v676_v61 }
  0x2c   : > { %2017 = vmatmul.mubr.msk.f32.gmra.mxu1 %vm642_vm2, %v418_v57  ;;  %2026 = vmatprep.subr.mxu1 %v1260_v12 }
  0x2d   : > { %2019 = vmatprep.mubr.msk.f32.mxu1 %vm642_vm2, %v419_v63  ;;  %2058 = vmatprep.subr.mxu0 %v1256_v13 }
  0x2e   : > { %1991 = vmatmul.mubr.msk.f32.gmra.mxu0 %vm432_vm1, %v402_v52  ;;  %680 = vadd.xlane.f32.xlu0 %v679_v1 }
  0x2f   : > { %1993 = vmatprep.mubr.msk.f32.mxu0 %vm432_vm1, %v403_v55  ;;  %683 = vadd.xlane.f32.xlu1 %v682_v3 }
  0x30   : > { %2020 = vmatmul.mubr.msk.f32.gmra.mxu1 %vm642_vm2, %v420_v0  ;;  %2059 = vmatpush3.msra.mxu0 %v1256_v13 }
  0x31   : > { %2027 = vmatpush3.msra.mxu1 %v1260_v12  ;;  %2060 = vmatprep.subr.mxu0 %v1255_v32 }
  0x32   : > { %1994 = vmatmul.mubr.msk.f32.gmra.mxu0 %vm432_vm1, %v404_v60  ;;  %686 = vadd.xlane.f32.xlu0 %v685_v5 }
  0x33   : > { %689 = vadd.xlane.f32.xlu1 %v688_v6  ;;  %2028 = vmatprep.subr.mxu1 %v1259_v14 }
  0x34   : > { %2029 = vmatpush3.msra.mxu1 %v1259_v14  ;;  %2061 = vmatpush3.msra.mxu0 %v1255_v32 }
  0x9f   : > { %v645_v15 = vpop.xlane.xlu0 %644 }
  0xa0   : > { %v651_v16 = vpop.xlane.xlu1 %650  ;;  %v698_v40 = vadd.f32 %v2375_v27, %v645_v15 }
  0xa1   : > { %v700_v55 = vadd.f32 %v2375_v27, %v651_v16 }
  0xa3   : > { %v648_v17 = vpop.xlane.xlu0 %647 }
  0xa4   : > { %v654_v18 = vpop.xlane.xlu1 %653  ;;  %v699_v34 = vadd.f32 %v2375_v27, %v648_v17 }
  0xa5   : > { %v701_v58 = vadd.f32 %v2375_v27, %v654_v18 }
  0xa7   : > { %v657_v19 = vpop.xlane.xlu0 %656 }
  0xa8   : > { %v660_v20 = vpop.xlane.xlu1 %659  ;;  %v702_v1 = vadd.f32 %v2375_v27, %v657_v19 }
  0xa9   : > { %v703_v2 = vadd.f32 %v2375_v27, %v660_v20 }
  0xab   : > { %v663_v21 = vpop.xlane.xlu0 %662 }
  0xac   : > { %v666_v22 = vpop.xlane.xlu1 %665  ;;  %v2397_v4 = vadd.f32 %v2375_v27, %v663_v21 }
  0xad   : > { %v2400_v5 = vadd.f32 %v2375_v27, %v666_v22 }
  0xaf   : > { %v669_v24 = vpop.xlane.xlu0 %668 }
  0xb0   : > { %v672_v31 = vpop.xlane.xlu1 %671  ;;  %v2403_v6 = vadd.f32 %v2375_v27, %v669_v24 }
  0xb1   : > { %v2407_v11 = vadd.f32 %v2375_v27, %v672_v31 }
  0xb3   : > { %v675_v38 = vpop.xlane.xlu0 %674 }
  0xb4   : > { %v678_v50 = vpop.xlane.xlu1 %677  ;;  %v2410_v16 = vadd.f32 %v2375_v27, %v675_v38 }
  0xb5   : > { %v2413_v17 = vadd.f32 %v2375_v27, %v678_v50 }
  0xb7   : > { %v681_v59 = vpop.xlane.xlu0 %680 }
  0xb8   : > { %v684_v12 = vpop.xlane.xlu1 %683 }
  0xbb   : > { %v687_v24 = vpop.xlane.xlu0 %686 }
  0xd4   : > { %v2000_v37 = vpop.f32.mrf.mxu1 }
  0xd5   : > { %v913_v41 = vmul.f32 2.0, %v2000_v37  ;;  %v2432_v37 = vadd.f32 %v2375_v27, %v687_v24 }
  0xd6   : > { %v1974_v25 = vpop.f32.mrf.mxu0  ;;  %v833_v44 = vpop.f32.mrf.mxu1 }
  0xd7   : > { %v553_v26 = vadd.f32 %v1974_v25, %v2369_v23  ;;  %v912_v46 = vmul.f32 2.0, %v833_v44  ;;  %v929_v47 = vsub.f32 %v699_v34, %v913_v41 }
  0xd8   : > { %v547_v28 = vpop.f32.mrf.mxu0  ;;  %v2003_v49 = vpop.f32.mrf.mxu1 }
  0xd9   : > { %v1144_v29 = vadd.f32 1.0, %v553_v26  ;;  %v548_v30 = vadd.f32 %v2369_v23, %v547_v28  ;;  %v928_v52 = vsub.f32 %v698_v40, %v912_v46  ;;  %v2386_v53 = vmax.f32 %v929_v47, 0.0 }
  0xda   : > { %v1977_v33 = vpop.f32.mrf.mxu0  ;;  %v915_v56 = vmul.f32 2.0, %v2003_v49  ;;  %v843_v57 = vpop.f32.mrf.mxu1 }
  0xdb   : > { %v1143_v35 = vadd.f32 1.0, %v548_v30  ;;  %v563_v36 = vadd.f32 %v1977_v33, %v2369_v23  ;;  %1166 = vperm.xlu1 %2096, %v1144_v29   ;;  %v2390_v61 = vmax.f32 %v928_v52, 0.0  ;;  %2097 = vrsqrt.f32 %v2386_v53 }
  0xdc   : > { %v557_v39 = vpop.f32.mrf.mxu0  ;;  %v914_v63 = vmul.f32 2.0, %v843_v57  ;;  %v2006_v0 = vpop.f32.mrf.mxu1  ;;  %v931_v9 = vsub.f32 %v701_v58, %v915_v56  ;;  %v2422_v29 = vadd.f32 %v2375_v27, %v681_v59  ;;  %v2425_v30 = vadd.f32 %v2375_v27, %v684_v12  ;;  %v2471_v12 = vld [vmem:[%s2768_s6] ss:$0 sm:$0xff] }
  0xdd   : > { %v1146_v42 = vadd.f32 1.0, %v563_v36  ;;  %v558_v43 = vadd.f32 %v2369_v23, %v557_v39  ;;  %1161 = vperm.xlu0 %2095, %v1143_v35   ;;  %2099 = vrsqrt.f32 %v2390_v61  ;;  %v917_v14 = vmul.f32 2.0, %v2006_v0 }
  0xde   : > { %v1980_v45 = vpop.f32.mrf.mxu0  ;;  %v930_v8 = vsub.f32 %v700_v55, %v914_v63  ;;  %v853_v10 = vpop.f32.mrf.mxu1  ;;  %v2419_v21 = vmax.f32 %v931_v9, 0.0  ;;  %vm969_vm3 = vcmp.eq.f32.partialorder %v2386_v53, inf  ;;  %vm971_vm4 = vcmp.eq.f32.partialorder %v2386_v53, 0.0 }
  0xdf   : > { %v573_v48 = vadd.f32 %v1980_v45, %v2369_v23  ;;  %1176 = vperm.xlu1 %2096, %v1146_v42   ;;  %v1145_v54 = vadd.f32 1.0, %v558_v43  ;;  %v916_v15 = vmul.f32 2.0, %v853_v10  ;;  %v933_v28 = vsub.f32 %v703_v2, %v917_v14 }
  0xe0   : > { %v567_v51 = vpop.f32.mrf.mxu0  ;;  %v2417_v20 = vmax.f32 %v930_v8, 0.0  ;;  %v2009_v22 = vpop.f32.mrf.mxu1  ;;  %v972_v40 = vand.u32 2147483648, %v2386_v53  ;;  %vm962_vm5 = vcmp.eq.f32.partialorder %v2390_v61, inf  ;;  %vm964_vm6 = vcmp.eq.f32.partialorder %v2390_v61, 0.0 }
  0xe1   : > { %v1148_v62 = vadd.f32 1.0, %v573_v48  ;;  %v568_v7 = vadd.f32 %v2369_v23, %v567_v51  ;;  %v932_v26 = vsub.f32 %v702_v1, %v916_v15  ;;  %v919_v33 = vmul.f32 2.0, %v2009_v22 }
  0xe2   : > { %v1983_v60 = vpop.f32.mrf.mxu0  ;;  %2101 = vrsqrt.f32 %v2417_v20  ;;  %v863_v34 = vpop.f32.mrf.mxu1  ;;  %v2440_v45 = vmax.f32 %v933_v28, 0.0  ;;  %v965_v51 = vand.u32 2147483648, %v2390_v61  ;;  %vm976_vm7 = vcmp.eq.f32.partialorder %v2417_v20, inf }
  0xe3   : > { %1171 = vperm.xlu1 %2096, %v1145_v54   ;;  %v583_v18 = vadd.f32 %v1983_v60, %v2369_v23  ;;  %v1147_v31 = vadd.f32 1.0, %v568_v7  ;;  %2103 = vrsqrt.f32 %v2419_v21  ;;  %v2438_v44 = vmax.f32 %v932_v26, 0.0 }
  0xe4   : > { %v577_v3 = vpop.f32.mrf.mxu0  ;;  %v2012_v41 = vpop.f32.mrf.mxu1  ;;  %v918_v46 = vmul.f32 2.0, %v863_v34  ;;  %v935_v48 = vsub.f32 %v2400_v5, %v919_v33  ;;  %vm978_vm8 = vcmp.eq.f32.partialorder %v2417_v20, 0.0  ;;  %v979_v55 = vand.u32 2147483648, %v2417_v20 }
  0xe5   : > { %v578_v35 = vadd.f32 %v2369_v23, %v577_v3  ;;  %v1150_v38 = vadd.f32 1.0, %v583_v18  ;;  %2105 = vrsqrt.f32 %v2438_v44  ;;  %vm983_vm9 = vcmp.eq.f32.partialorder %v2419_v21, inf }
  0xe6   : > { %v1986_v13 = vpop.f32.mrf.mxu0  ;;  %2107 = vrsqrt.f32 %v2440_v45  ;;  %v873_v56 = vpop.f32.mrf.mxu1  ;;  %vm985_vm10 = vcmp.eq.f32.partialorder %v2419_v21, 0.0  ;;  %v934_v60 = vsub.f32 %v2397_v4, %v918_v46  ;;  %v986_v0 = vand.u32 2147483648, %v2419_v21 }
  0xe7   : > { %v593_v19 = vadd.f32 %v1986_v13, %v2369_v23  ;;  %1186 = vperm.xlu1 %2096, %v1148_v62   ;;  %v1149_v49 = vadd.f32 1.0, %v578_v35  ;;  %v2457_v1 = vmax.f32 %v935_v48, 0.0  ;;  %v921_v2 = vmul.f32 2.0, %v2012_v41 }
  0xe8   : > { %v587_v25 = vpop.f32.mrf.mxu0  ;;  %v2098_v52 = vpop.eup %2097  ;;  %v2464_v9 = vmax.f32 %v934_v60, 0.0  ;;  %vm990_vm11 = vcmp.eq.f32.partialorder %v2438_v44, inf  ;;  %vm992_vm12 = vcmp.eq.f32.partialorder %v2438_v44, 0.0  ;;  %v993_v24 = vand.u32 2147483648, %v2438_v44 }
  0xe9   : > { %v1152_v32 = vadd.f32 1.0, %v593_v19  ;;  %v588_v42 = vadd.f32 %v2369_v23, %v587_v25  ;;  %v968_v59 = vmul.f32 %v2098_v52, %v2386_v53  ;;  %2109 = vrsqrt.f32 %v2457_v1  ;;  %v2015_v14 = vpop.f32.mrf.mxu1 }
  0xea   : > { %v1989_v36 = vpop.f32.mrf.mxu0  ;;  %v2100_v62 = vpop.eup %2099  ;;  %2111 = vrsqrt.f32 %v2464_v9  ;;  %v920_v19 = vmul.f32 2.0, %v873_v56  ;;  %v937_v25 = vsub.f32 %v2407_v11, %v921_v2  ;;  %vm997_vm13 = vcmp.eq.f32.partialorder %v2440_v45, inf }
  0xeb   : > { %v603_v39 = vadd.f32 %v1989_v36, %v2369_v23  ;;  %1181 = vperm.xlu1 %2096, %v1147_v31   ;;  %1206 = vperm.xlu0 %2095, %v1152_v32   ;;  %v1151_v57 = vadd.f32 1.0, %v588_v42  ;;  %v961_v7 = vmul.f32 %v2100_v62, %v2390_v61  ;;  %v970_v8 = vsel %vm969_vm3, %v2386_v53, %v968_v59 }
  0xec   : > { %v597_v43 = vpop.f32.mrf.mxu0  ;;  %v973_v13 = vsel %vm971_vm4, %v972_v40, %v970_v8  ;;  %vm999_vm14 = vcmp.eq.f32.partialorder %v2440_v45, 0.0  ;;  %v936_v41 = vsub.f32 %v2403_v6, %v920_v19  ;;  %vm1004_vm15 = vcmp.eq.f32.partialorder %v2464_v9, inf }
  0xed   : > { %v1154_v47 = vadd.f32 1.0, %v603_v39  ;;  %v598_v3 = vadd.f32 %v2369_v23, %v597_v43  ;;  %v963_v15 = vsel %vm962_vm5, %v2390_v61, %v961_v7  ;;  %v1073_v18 = vsub.f32 0.0, %v973_v13 }
  0xee   : > { %v1992_v50 = vpop.f32.mrf.mxu0  ;;  %v966_v53 = vsel %vm964_vm6, %v965_v51, %v963_v15  ;;  %v1000_v61 = vand.u32 2147483648, %v2440_v45  ;;  %v1007_v46 = vand.u32 2147483648, %v2464_v9  ;;  %vm1006_vm0 = vcmp.eq.f32.partialorder %v2464_v9, 0.0 }
  0xef   : > { %v613_v54 = vadd.f32 %v1992_v50, %v2369_v23  ;;  %1196 = vperm.xlu1 %2096, %v1150_v38   ;;  %1216 = vperm.xlu0 %2095, %v1154_v47   ;;  %v2102_v26 = vpop.eup %2101  ;;  %v1153_v28 = vadd.f32 1.0, %v598_v3  ;;  %v1072_v32 = vsub.f32 0.0, %v966_v53  ;;  %v1096_v33 = vmul.f32 %v2471_v12, %v1073_v18  ;;  %v883_v38 = vpop.f32.mrf.mxu1 }
  0xf0   : > { %v607_v58 = vpop.f32.mrf.mxu0  ;;  %v2104_v34 = vpop.eup %2103  ;;  %v975_v36 = vmul.f32 %v2102_v26, %v2417_v20  ;;  %v2500_v47 = vmax.f32 %v937_v25, 0.0  ;;  %v2512_v52 = vmax.f32 %v936_v41, 0.0  ;;  %vm1011_vm2 = vcmp.eq.f32.partialorder %v2457_v1, inf }
  0xf1   : > { %v1156_v63 = vadd.f32 1.0, %v613_v54  ;;  %v608_v4 = vadd.f32 %v2369_v23, %v607_v58  ;;  %v1095_v11 = vmul.f32 %v2471_v12, %v1072_v32  ;;  %v1113_v39 = vmul.f32 1.442695, %v1096_v33  ;;  %v2018_v54 = vpop.f32.mrf.mxu1 }
  0xf2   : > { %v1995_v5 = vpop.f32.mrf.mxu0  ;;  %v982_v40 = vmul.f32 %v2104_v34, %v2419_v21  ;;  %v977_v43 = vsel %vm976_vm7, %v2417_v20, %v975_v36  ;;  %v2106_v6 = vpop.eup %2105  ;;  %vm1013_vm3 = vcmp.eq.f32.partialorder %v2457_v1, 0.0  ;;  %v1014_v13 = vand.u32 2147483648, %v2457_v1 }
  0xf3   : > { %v623_v10 = vadd.f32 %v1995_v5, %v2369_v23  ;;  %1191 = vperm.xlu1 %2096, %v1149_v49   ;;  %1226 = vperm.xlu0 %2095, %v1156_v63   ;;  %v1155_v35 = vadd.f32 1.0, %v608_v4  ;;  %v1111_v48 = vmul.f32 1.442695, %v1095_v11  ;;  %2113 = vpow2.f32 %v1113_v39  ;;  %v2108_v56 = vpop.eup %2107  ;;  %v893_v5 = vpop.f32.mrf.mxu1 }
  0xf4   : > { %v617_v31 = vpop.f32.mrf.mxu0  ;;  %v980_v49 = vsel %vm978_vm8, %v979_v55, %v977_v43  ;;  %2115 = vrsqrt.f32 %v2500_v47  ;;  %v989_v55 = vmul.f32 %v2106_v6, %v2438_v44  ;;  %v996_v58 = vmul.f32 %v2108_v56, %v2440_v45 }
  0xf5   : > { %v1158_v22 = vadd.f32 1.0, %v623_v10  ;;  %v618_v42 = vadd.f32 %v2369_v23, %v617_v31  ;;  %v984_v23 = vsel %vm983_vm9, %v2419_v21, %v982_v40  ;;  %v1074_v50 = vsub.f32 0.0, %v980_v49  ;;  %v690_v31 = vpop.xlane.xlu1 %689 }
  0xf6   : > { %v987_v51 = vsel %vm985_vm10, %v986_v0, %v984_v23  ;;  %2117 = vpow2.f32 %v1111_v48  ;;  %v922_v21 = vmul.f32 2.0, %v883_v38  ;;  %v991_v62 = vsel %vm990_vm11, %v2438_v44, %v989_v55  ;;  %v2110_v7 = vpop.eup %2109 }
  0xf7   : > { %1201 = vperm.xlu1 %2096, %v1151_v57   ;;  %1236 = vperm.xlu0 %2095, %v1158_v22   ;;  %v1075_v20 = vsub.f32 0.0, %v987_v51  ;;  %v1097_v57 = vmul.f32 %v2471_v12, %v1074_v50  ;;  %2119 = vrsqrt.f32 %v2512_v52  ;;  %v1157_v59 = vadd.f32 1.0, %v618_v42 }
  0xf8   : > { %v923_v63 = vmul.f32 2.0, %v2015_v14  ;;  %v994_v2 = vsel %vm992_vm12, %v993_v24, %v991_v62  ;;  %v998_v3 = vsel %vm997_vm13, %v2440_v45, %v996_v58  ;;  %v2112_v14 = vpop.eup %2111  ;;  %v1010_v44 = vmul.f32 %v2110_v7, %v2457_v1 }
  0xf9   : > { %v1098_v60 = vmul.f32 %v2471_v12, %v1075_v20  ;;  %v1115_v0 = vmul.f32 1.442695, %v1097_v57  ;;  %v1076_v4 = vsub.f32 0.0, %v994_v2  ;;  %v1001_v10 = vsel %vm999_vm14, %v1000_v61, %v998_v3 }
  0xfa   : > { %v1077_v15 = vsub.f32 0.0, %v1001_v10  ;;  %v938_v18 = vsub.f32 %v2410_v16, %v922_v21  ;;  %v1003_v22 = vmul.f32 %v2112_v14, %v2464_v9  ;;  %v939_v53 = vsub.f32 %v2413_v17, %v923_v63 }
  0xfb   : > { %1211 = vperm.xlu1 %2096, %v1153_v28   ;;  %v1117_v8 = vmul.f32 1.442695, %v1098_v60  ;;  %2121 = vpow2.f32 %v1115_v0  ;;  %v1099_v19 = vmul.f32 %v2471_v12, %v1076_v4  ;;  %v1012_v24 = vsel %vm1011_vm2, %v2457_v1, %v1010_v44  ;;  %v2021_v28 = vpop.f32.mrf.mxu1 }
  0xfc   : > { %v1100_v45 = vmul.f32 %v2471_v12, %v1077_v15  ;;  %v2542_v25 = vmax.f32 %v938_v18, 0.0  ;;  %v925_v26 = vmul.f32 2.0, %v2018_v54  ;;  %v1005_v32 = vsel %vm1004_vm15, %v2464_v9, %v1003_v22 }
  0xfd   : > { %2123 = vpow2.f32 %v1117_v8  ;;  %v1119_v16 = vmul.f32 1.442695, %v1099_v19  ;;  %v1015_v17 = vsel %vm1013_vm3, %v1014_v13, %v1012_v24  ;;  %v2549_v33 = vmax.f32 %v939_v53, 0.0  ;;  %v903_v9 = vpop.f32.mrf.mxu1 }
  0xfe   : > { %v1121_v34 = vmul.f32 1.442695, %v1100_v45  ;;  %v1079_v36 = vsub.f32 0.0, %v1015_v17  ;;  %2125 = vrsqrt.f32 %v2542_v25  ;;  %vm1025_vm4 = vcmp.eq.f32.partialorder %v2500_v47, inf }
  0xff   : > { %1221 = vperm.xlu1 %2096, %v1155_v35   ;;  %v1008_v35 = vsel %vm1006_vm0, %v1007_v46, %v1005_v32  ;;  %2127 = vpow2.f32 %v1119_v16  ;;  %v713_v38 = vadd.f32 %v2375_v27, %v690_v31  ;;  %vm1018_vm5 = vcmp.eq.f32.partialorder %v2512_v52, inf }
 0x100   : > { %v1078_v61 = vsub.f32 0.0, %v1008_v35  ;;  %v2556_v11 = vpop.eup %2113  ;;  %2129 = vpow2.f32 %v1121_v34  ;;  %v1102_v1 = vmul.f32 %v2471_v12, %v1079_v36  ;;  %vm1020_vm6 = vcmp.eq.f32.partialorder %v2512_v52, 0.0 }
 0x101   : > { %v2116_v39 = vpop.eup %2115  ;;  %vm1027_vm7 = vcmp.eq.f32.partialorder %v2500_v47, 0.0  ;;  %v1028_v41 = vand.u32 2147483648, %v2500_v47  ;;  %2131 = vrsqrt.f32 %v2549_v33  ;;  %v924_v46 = vmul.f32 2.0, %v893_v5 }
 0x102   : > { %v1101_v40 = vmul.f32 %v2471_v12, %v1078_v61  ;;  %v1125_v42 = vmul.f32 1.442695, %v1102_v1  ;;  %v1024_v43 = vmul.f32 %v2116_v39, %v2500_v47  ;;  %v941_v48 = vsub.f32 %v2425_v30, %v925_v26 }
 0x103   : > { %1231 = vperm.xlu1 %2096, %v1157_v59   ;;  %v2565_v27 = vpop.eup %2117  ;;  %v1021_v6 = vand.u32 2147483648, %v2512_v52  ;;  %v927_v50 = vmul.f32 2.0, %v2021_v28  ;;  %v926_v51 = vmul.f32 2.0, %v903_v9  ;;  %v940_v20 = vsub.f32 %v2422_v29, %v924_v46 }
 0x104   : > { %v2120_v49 = vpop.eup %2119  ;;  %v1123_v23 = vmul.f32 1.442695, %v1101_v40  ;;  %2030 = vmatprep.mubr.msk.f32.mxu1 %vm432_vm1, %v2565_v27  ;;  %2133 = vpow2.f32 %v1125_v42  ;;  %v1026_v56 = vsel %vm1025_vm4, %v2500_v47, %v1024_v43  ;;  %v2581_v55 = vmax.f32 %v941_v48, 0.0 }
 0x105   : > { %v1017_v54 = vmul.f32 %v2120_v49, %v2512_v52  ;;  %2031 = vmatmul.mubr.msk.f32.vlgmr.msra.gmra.mxu1 %vm432_vm1, %v2556_v11  ;;  %v1029_v30 = vsel %vm1027_vm7, %v1028_v41, %v1026_v56  ;;  %v942_v57 = vsub.f32 %v2432_v37, %v926_v51  ;;  %v2587_v59 = vmax.f32 %v940_v20, 0.0 }
 0x106   : > { %2135 = vpow2.f32 %v1123_v23  ;;  %v1081_v21 = vsub.f32 0.0, %v1029_v30  ;;  %v943_v60 = vsub.f32 %v713_v38, %v927_v50  ;;  %vm1032_vm8 = vcmp.eq.f32.partialorder %v2542_v25, inf }
 0x107   : > { %v1019_v58 = vsel %vm1018_vm5, %v2512_v52, %v1017_v54  ;;  %2137 = vrsqrt.f32 %v2581_v55  ;;  %v2600_v0 = vmax.f32 %v942_v57, 0.0  ;;  %v1035_v7 = vand.u32 2147483648, %v2542_v25 }
 0x108   : > { %v2589_v29 = vpop.eup %2121  ;;  %v1022_v62 = vsel %vm1020_vm6, %v1021_v6, %v1019_v58  ;;  %v1104_v37 = vmul.f32 %v2471_v12, %v1081_v21  ;;  %2139 = vrsqrt.f32 %v2587_v59  ;;  %v2605_v3 = vmax.f32 %v943_v60, 0.0 }
 0x109   : > { %v1080_v63 = vsub.f32 0.0, %v1022_v62  ;;  %2033 = vmatprep.mubr.msk.f32.mxu1 %vm432_vm1, %v2589_v29  ;;  %2141 = vrsqrt.f32 %v2600_v0  ;;  %vm1034_vm9 = vcmp.eq.f32.partialorder %v2542_v25, 0.0  ;;  %vm1039_vm10 = vcmp.eq.f32.partialorder %v2549_v33, inf }
 0x10a   : > { %v2594_v47 = vpop.eup %2123  ;;  %v1129_v2 = vmul.f32 1.442695, %v1104_v37  ;;  %v1042_v44 = vand.u32 2147483648, %v2549_v33  ;;  %vm1041_vm11 = vcmp.eq.f32.partialorder %v2549_v33, 0.0  ;;  %vm1053_vm12 = vcmp.eq.f32.partialorder %v2581_v55, inf }
 0x10b   : > { %2034 = vmatmul.mubr.msk.f32.gmra.mxu1 %vm432_vm1, %v2594_v47  ;;  %v1103_v52 = vmul.f32 %v2471_v12, %v1080_v63  ;;  %v2126_v5 = vpop.eup %2125  ;;  %vm1055_vm13 = vcmp.eq.f32.partialorder %v2581_v55, 0.0  ;;  %v1056_v32 = vand.u32 2147483648, %v2581_v55  ;;  %vm1046_vm14 = vcmp.eq.f32.partialorder %v2587_v59, inf }
 0x10c   : > { %v2610_v8 = vpop.eup %2127  ;;  %2143 = vpow2.f32 %v1129_v2  ;;  %v1031_v10 = vmul.f32 %v2126_v5, %v2542_v25  ;;  %v1049_v34 = vand.u32 2147483648, %v2587_v59  ;;  %vm1048_vm15 = vcmp.eq.f32.partialorder %v2587_v59, 0.0 }
 0x10d   : > { %v1127_v4 = vmul.f32 1.442695, %v1103_v52  ;;  %v2614_v13 = vpop.eup %2129  ;;  %2145 = vrsqrt.f32 %v2605_v3  ;;  %2036 = vmatprep.mubr.msk.f32.mxu1 %vm432_vm1, %v2610_v8  ;;  %vm1060_vm0 = vcmp.eq.f32.partialorder %v2600_v0, inf  ;;  %vm1062_vm2 = vcmp.eq.f32.partialorder %v2600_v0, 0.0 }
 0x10e   : > { %v2132_v14 = vpop.eup %2131  ;;  %v1033_v15 = vsel %vm1032_vm8, %v2542_v25, %v1031_v10  ;;  %v1063_v40 = vand.u32 2147483648, %v2600_v0  ;;  %vm1067_vm3 = vcmp.eq.f32.partialorder %v2605_v3, inf  ;;  %v1070_v23 = vand.u32 2147483648, %v2605_v3 }
 0x10f   : > { %2147 = vpow2.f32 %v1127_v4  ;;  %2037 = vmatmul.mubr.msk.f32.gmra.mxu1 %vm432_vm1, %v2614_v13  ;;  %v1036_v18 = vsel %vm1034_vm9, %v1035_v7, %v1033_v15  ;;  %v1038_v19 = vmul.f32 %v2132_v14, %v2549_v33  ;;  %vm1069_vm4 = vcmp.eq.f32.partialorder %v2605_v3, 0.0 }
 0x110   : > { %v1082_v22 = vsub.f32 0.0, %v1036_v18  ;;  %vm1720_vm5 = vcmask 7168  }
 0x111   : > { %v2626_v53 = vpop.eup %2133  ;;  %v1040_v45 = vsel %vm1039_vm10, %v2549_v33, %v1038_v19 }
 0x112   : > { %v1105_v25 = vmul.f32 %v2471_v12, %v1082_v22  ;;  %v1043_v26 = vsel %vm1041_vm11, %v1042_v44, %v1040_v45 }
 0x113   : > { %v2629_v24 = vpop.eup %2135  ;;  %v1083_v28 = vsub.f32 0.0, %v1043_v26 }
 0x114   : > { %2039 = vmatprep.mubr.msk.f32.mxu1 %vm432_vm1, %v2629_v24  ;;  %v2138_v31 = vpop.eup %2137  ;;  %v1131_v16 = vmul.f32 1.442695, %v1105_v25 }
 0x115   : > { %2040 = vmatmul.mubr.msk.f32.gmra.mxu1 %vm432_vm1, %v2626_v53  ;;  %v2140_v17 = vpop.eup %2139  ;;  %v1106_v33 = vmul.f32 %v2471_v12, %v1083_v28  ;;  %v1052_v35 = vmul.f32 %v2138_v31, %v2581_v55 }
 0x116   : > { %2149 = vpow2.f32 %v1131_v16  ;;  %v1045_v36 = vmul.f32 %v2140_v17, %v2587_v59  ;;  %v2142_v1 = vpop.eup %2141 }
 0x117   : > { %v1133_v61 = vmul.f32 1.442695, %v1106_v33  ;;  %v1054_v38 = vsel %vm1053_vm12, %v2581_v55, %v1052_v35  ;;  %v1059_v46 = vmul.f32 %v2142_v1, %v2600_v0 }
 0x118   : > { %v1047_v9 = vsel %vm1046_vm14, %v2587_v59, %v1045_v36  ;;  %v1057_v39 = vsel %vm1055_vm13, %v1056_v32, %v1054_v38 }
 0x119   : > { %v2652_v41 = vpop.eup %2143  ;;  %2151 = vpow2.f32 %v1133_v61  ;;  %v1050_v42 = vsel %vm1048_vm15, %v1049_v34, %v1047_v9  ;;  %v1085_v43 = vsub.f32 0.0, %v1057_v39  ;;  %v1061_v51 = vsel %vm1060_vm0, %v2600_v0, %v1059_v46 }
 0x11a   : > { %v2146_v48 = vpop.eup %2145  ;;  %v1084_v49 = vsub.f32 0.0, %v1050_v42  ;;  %v1064_v20 = vsel %vm1062_vm2, %v1063_v40, %v1061_v51 }
 0x11b   : > { %v1108_v50 = vmul.f32 %v2471_v12, %v1085_v43  ;;  %v1066_v54 = vmul.f32 %v2146_v48, %v2605_v3  ;;  %v1086_v55 = vsub.f32 0.0, %v1064_v20  ;;  %v2703_v48 = vld [vmem:[#allocation3] ss:$0 sm:$0xff] }
 0x11c   : > { %v2148_v6 = vpop.eup %2147  ;;  %v1107_v56 = vmul.f32 %v2471_v12, %v1084_v49 }
 0x11d   : > { %2042 = vmatprep.mubr.msk.f32.mxu1 %vm432_vm1, %v2148_v6  ;;  %v1137_v30 = vmul.f32 1.442695, %v1108_v50  ;;  %v1068_v57 = vsel %vm1067_vm3, %v2605_v3, %v1066_v54  ;;  %v1109_v59 = vmul.f32 %v2471_v12, %v1086_v55 }
 0x11e   : > { %2043 = vmatmul.mubr.msk.f32.gmra.mxu1 %vm432_vm1, %v2652_v41  ;;  %v1135_v58 = vmul.f32 1.442695, %v1107_v56  ;;  %v1071_v21 = vsel %vm1069_vm4, %v1070_v23, %v1068_v57 }
 0x11f   : > { %2153 = vpow2.f32 %v1137_v30  ;;  %v1087_v60 = vsub.f32 0.0, %v1071_v21  ;;  %v1139_v62 = vmul.f32 1.442695, %v1109_v59 }
 0x120   : > { %2155 = vpow2.f32 %v1135_v58 }
 0x121   : > { %v1110_v63 = vmul.f32 %v2471_v12, %v1087_v60  ;;  %2157 = vpow2.f32 %v1139_v62 }
 0x123   : > { %v2150_v37 = vpop.eup %2149  ;;  %v1141_v0 = vmul.f32 1.442695, %v1110_v63 }
 0x124   : > { %2045 = vmatprep.mubr.msk.f32.mxu1 %vm432_vm1, %v2150_v37 }
 0x125   : > { %2159 = vpow2.f32 %v1141_v0 }
 0x126   : > { %v2152_v52 = vpop.eup %2151 }
 0x127   : > { %2046 = vmatmul.mubr.msk.f32.gmra.mxu1 %vm432_vm1, %v2152_v52 }
 0x12c   : > { %v2154_v2 = vpop.eup %2153 }
 0x12d   : > { %v2156_v3 = vpop.eup %2155 }
 0x12e   : > { %2048 = vmatprep.mubr.msk.f32.mxu1 %vm432_vm1, %v2156_v3  ;;  %v2158_v5 = vpop.eup %2157 }
 0x12f   : > { %2049 = vmatmul.mubr.msk.f32.gmra.mxu1 %vm432_vm1, %v2154_v2 }
 0x130   : > { %2051 = vmatprep.mubr.msk.f32.mxu1 %vm432_vm1, %v2158_v5 }
 0x132   : > { %v2160_v7 = vpop.eup %2159 }
 0x133   : > { %2052 = vmatmul.mubr.msk.f32.gmra.mxu1 %vm432_vm1, %v2160_v7 }
 0x156   : > { %v1167_v12 = vpop.permute.xlu1 %1166 }
 0x157   : > { %v1240_v14 = vmul.f32 %v2556_v11, %v1167_v12 }
 0x158   : > { %v1162_v4 = vpop.permute.xlu0 %1161 }
 0x159   : > { %v1239_v10 = vmul.f32 %v2565_v27, %v1162_v4 }
 0x15a   : > { %v1177_v15 = vpop.permute.xlu1 %1176 }
 0x15b   : > { %2062 = vmatprep.mubr.msk.f32.mxu0 %vm432_vm1, %v1239_v10  ;;  %v1242_v19 = vmul.f32 %v2594_v47, %v1177_v15 }
 0x15c   : > { %2063 = vmatmul.mubr.msk.f32.vlgmr.msra.gmra.mxu0 %vm432_vm1, %v1240_v14 }
 0x15e   : > { %v1172_v44 = vpop.permute.xlu1 %1171 }
 0x15f   : > { %v1241_v18 = vmul.f32 %v2589_v29, %v1172_v44 }
 0x161   : > { %2065 = vmatprep.mubr.msk.f32.mxu0 %vm432_vm1, %v1241_v18 }
 0x162   : > { %v1187_v22 = vpop.permute.xlu1 %1186  ;;  %2066 = vmatmul.mubr.msk.f32.gmra.mxu0 %vm432_vm1, %v1242_v19 }
 0x163   : > { %v1244_v11 = vmul.f32 %v2614_v13, %v1187_v22 }
 0x166   : > { %v1182_v45 = vpop.permute.xlu1 %1181  ;;  %v1207_v26 = vpop.permute.xlu0 %1206 }
 0x167   : > { %v1243_v27 = vmul.f32 %v2610_v8, %v1182_v45  ;;  %v1248_v13 = vmul.f32 %v2652_v41, %v1207_v26 }
 0x169   : > { %2068 = vmatprep.mubr.msk.f32.mxu0 %vm432_vm1, %v1243_v27 }
 0x16a   : > { %v1197_v25 = vpop.permute.xlu1 %1196  ;;  %2069 = vmatmul.mubr.msk.f32.gmra.mxu0 %vm432_vm1, %v1244_v11  ;;  %v1217_v31 = vpop.permute.xlu0 %1216 }
 0x16b   : > { %v1246_v47 = vmul.f32 %v2626_v53, %v1197_v25  ;;  %v1250_v34 = vmul.f32 %v2152_v52, %v1217_v31 }
 0x16e   : > { %v1192_v28 = vpop.permute.xlu1 %1191  ;;  %v1227_v17 = vpop.permute.xlu0 %1226 }
 0x16f   : > { %v1245_v29 = vmul.f32 %v2629_v24, %v1192_v28  ;;  %v1252_v35 = vmul.f32 %v2154_v2, %v1227_v17 }
 0x171   : > { %2071 = vmatprep.mubr.msk.f32.mxu0 %vm432_vm1, %v1245_v29 }
 0x172   : > { %v1202_v16 = vpop.permute.xlu1 %1201  ;;  %2072 = vmatmul.mubr.msk.f32.gmra.mxu0 %vm432_vm1, %v1246_v47  ;;  %v1237_v36 = vpop.permute.xlu0 %1236 }
 0x173   : > { %v1247_v8 = vmul.f32 %v2148_v6, %v1202_v16  ;;  %v1254_v1 = vmul.f32 %v2160_v7, %v1237_v36 }
 0x175   : > { %2074 = vmatprep.mubr.msk.f32.mxu0 %vm432_vm1, %v1247_v8 }
 0x176   : > { %v1212_v32 = vpop.permute.xlu1 %1211  ;;  %2075 = vmatmul.mubr.msk.f32.gmra.mxu0 %vm432_vm1, %v1248_v13 }
 0x177   : > { %v1249_v33 = vmul.f32 %v2150_v37, %v1212_v32 }
 0x179   : > { %2077 = vmatprep.mubr.msk.f32.mxu0 %vm432_vm1, %v1249_v33 }
 0x17a   : > { %v1222_v53 = vpop.permute.xlu1 %1221  ;;  %2078 = vmatmul.mubr.msk.f32.gmra.mxu0 %vm432_vm1, %v1250_v34 }
 0x17b   : > { %v1251_v24 = vmul.f32 %v2156_v3, %v1222_v53 }
 0x17d   : > { %2080 = vmatprep.mubr.msk.f32.mxu0 %vm432_vm1, %v1251_v24 }
 0x17e   : > { %v1232_v61 = vpop.permute.xlu1 %1231  ;;  %2081 = vmatmul.mubr.msk.f32.gmra.mxu0 %vm432_vm1, %v1252_v35 }
 0x17f   : > { %v1253_v38 = vmul.f32 %v2158_v5, %v1232_v61 }
 0x181   : > { %2083 = vmatprep.mubr.msk.f32.mxu0 %vm432_vm1, %v1253_v38 }
 0x182   : > { %2084 = vmatmul.mubr.msk.f32.gmra.mxu0 %vm432_vm1, %v1254_v1 }
 0x1c5   : > { %v2032_v9 = vpop.f32.mrf.mxu1 }
 0x1c7   : > { %v1377_v39 = vpop.f32.mrf.mxu1 }
 0x1cb   : > { %v2035_v40 = vpop.f32.mrf.mxu1 }
 0x1cd   : > { %v1387_v41 = vpop.f32.mrf.mxu1 }
 0x1cf   : > { %v2038_v42 = vpop.f32.mrf.mxu1 }
 0x1d1   : > { %v1397_v43 = vpop.f32.mrf.mxu1 }
 0x1d5   : > { %v2041_v51 = vpop.f32.mrf.mxu1 }
 0x1d7   : > { %v1407_v58 = vpop.f32.mrf.mxu1 }
 0x1de   : > { %v2044_v0 = vpop.f32.mrf.mxu1 }
 0x1e0   : > { %v1417_v12 = vpop.f32.mrf.mxu1 }
 0x1e7   : > { %v2047_v18 = vpop.f32.mrf.mxu1 }
 0x1e9   : > { %v1427_v25 = vpop.f32.mrf.mxu1 }
 0x1ef   : > { %v2050_v13 = vpop.f32.mrf.mxu1 }
 0x1f1   : > { %v1437_v38 = vpop.f32.mrf.mxu1 }
 0x21c   : > { %v2064_v46 = vpop.f32.mrf.mxu0 }
 0x21d   : > { %v1576_v49 = vadd.f32 %v2064_v46, %v2032_v9 }
 0x21e   : > { %v1570_v23 = vpop.f32.mrf.mxu0 }
 0x21f   : > { %v1657_v6 = vadd.f32 %v2703_v48, %v1576_v49  ;;  %v1571_v50 = vadd.f32 %v1570_v23, %v1377_v39 }
 0x221   : > { %vm1673_vm1 = vcmp.gt.f32.partialorder %v1657_v6, 0.0  ;;  %v1689_v54 = vmul.f32 0.2, %v1657_v6  ;;  %v1656_v56 = vadd.f32 %v2703_v48, %v1571_v50 }
 0x222   : > { %v2067_v20 = vpop.f32.mrf.mxu0 }
 0x223   : > { %v1705_v30 = vsel %vm1673_vm1, %v1657_v6, %v1689_v54  ;;  %vm1672_vm6 = vcmp.gt.f32.partialorder %v1656_v56, 0.0  ;;  %v1688_v55 = vmul.f32 0.2, %v1656_v56  ;;  %v1586_v57 = vadd.f32 %v2067_v20, %v2035_v40  ;;  %v2053_v6 = vpop.f32.mrf.mxu1 }
 0x224   : > { %1722 = vst.msk [vmem:[%s2710_s18 + $0x8] sm:$0xff] %vm1720_vm5, %v1705_v30  ;;  %v1580_v21 = vpop.f32.mrf.mxu0 }
 0x225   : > { %v1704_v59 = vsel %vm1672_vm6, %v1656_v56, %v1688_v55  ;;  %v1659_v60 = vadd.f32 %v2703_v48, %v1586_v57  ;;  %v1581_v62 = vadd.f32 %v1580_v21, %v1387_v41 }
 0x226   : > { %1721 = vst.msk [vmem:[%s2710_s18] sm:$0xff] %vm1720_vm5, %v1704_v59  ;;  %v1447_v59 = vpop.f32.mrf.mxu1 }
 0x227   : > { %vm1675_vm7 = vcmp.gt.f32.partialorder %v1659_v60, 0.0  ;;  %v1691_v63 = vmul.f32 0.2, %v1659_v60  ;;  %v1658_v37 = vadd.f32 %v2703_v48, %v1581_v62 }
 0x229   : > { %v1707_v52 = vsel %vm1675_vm7, %v1659_v60, %v1691_v63  ;;  %vm1674_vm8 = vcmp.gt.f32.partialorder %v1658_v37, 0.0  ;;  %v1690_v2 = vmul.f32 0.2, %v1658_v37 }
 0x22a   : > { %1724 = vst.msk [vmem:[%s2710_s18 + $0x18] sm:$0xff] %vm1720_vm5, %v1707_v52  ;;  %v2070_v3 = vpop.f32.mrf.mxu0 }
 0x22b   : > { %v1706_v5 = vsel %vm1674_vm8, %v1658_v37, %v1690_v2  ;;  %v1596_v7 = vadd.f32 %v2070_v3, %v2038_v42 }
 0x22c   : > { %1723 = vst.msk [vmem:[%s2710_s18 + $0x10] sm:$0xff] %vm1720_vm5, %v1706_v5  ;;  %v1590_v4 = vpop.f32.mrf.mxu0 }
 0x22d   : > { %v1661_v10 = vadd.f32 %v2703_v48, %v1596_v7  ;;  %v1591_v14 = vadd.f32 %v1590_v4, %v1397_v43 }
 0x22f   : > { %vm1677_vm9 = vcmp.gt.f32.partialorder %v1661_v10, 0.0  ;;  %v1693_v15 = vmul.f32 0.2, %v1661_v10  ;;  %v1660_v44 = vadd.f32 %v2703_v48, %v1591_v14 }
 0x231   : > { %v1709_v19 = vsel %vm1677_vm9, %v1661_v10, %v1693_v15  ;;  %vm1676_vm10 = vcmp.gt.f32.partialorder %v1660_v44, 0.0  ;;  %v1692_v22 = vmul.f32 0.2, %v1660_v44 }
 0x232   : > { %1726 = vst.msk [vmem:[%s2710_s18 + $0x28] sm:$0xff] %vm1720_vm5, %v1709_v19  ;;  %v2073_v45 = vpop.f32.mrf.mxu0 }
 0x233   : > { %v1708_v27 = vsel %vm1676_vm10, %v1660_v44, %v1692_v22  ;;  %v1606_v11 = vadd.f32 %v2073_v45, %v2041_v51 }
 0x234   : > { %1725 = vst.msk [vmem:[%s2710_s18 + $0x20] sm:$0xff] %vm1720_vm5, %v1708_v27  ;;  %v1600_v26 = vpop.f32.mrf.mxu0 }
 0x235   : > { %v1663_v28 = vadd.f32 %v2703_v48, %v1606_v11  ;;  %v1601_v29 = vadd.f32 %v1600_v26, %v1407_v58 }
 0x236   : > { %v2076_v47 = vpop.f32.mrf.mxu0 }
 0x237   : > { %vm1679_vm11 = vcmp.gt.f32.partialorder %v1663_v28, 0.0  ;;  %v1695_v31 = vmul.f32 0.2, %v1663_v28  ;;  %v1662_v16 = vadd.f32 %v2703_v48, %v1601_v29  ;;  %v1616_v8 = vadd.f32 %v2076_v47, %v2044_v0 }
 0x238   : > { %v1610_v32 = vpop.f32.mrf.mxu0 }
 0x239   : > { %v1711_v17 = vsel %vm1679_vm11, %v1663_v28, %v1695_v31  ;;  %vm1678_vm12 = vcmp.gt.f32.partialorder %v1662_v16, 0.0  ;;  %v1694_v33 = vmul.f32 0.2, %v1662_v16  ;;  %v1665_v34 = vadd.f32 %v2703_v48, %v1616_v8 }
 0x23a   : > { %1728 = vst.msk [vmem:[%s2710_s18 + $0x38] sm:$0xff] %vm1720_vm5, %v1711_v17  ;;  %v1611_v53 = vadd.f32 %v1610_v32, %v1417_v12  ;;  %v2079_v24 = vpop.f32.mrf.mxu0 }
 0x23b   : > { %v1710_v35 = vsel %vm1678_vm12, %v1662_v16, %v1694_v33  ;;  %vm1681_vm13 = vcmp.gt.f32.partialorder %v1665_v34, 0.0  ;;  %v1697_v36 = vmul.f32 0.2, %v1665_v34  ;;  %v1626_v61 = vadd.f32 %v2079_v24, %v2047_v18 }
 0x23c   : > { %1727 = vst.msk [vmem:[%s2710_s18 + $0x30] sm:$0xff] %vm1720_vm5, %v1710_v35  ;;  %v1664_v1 = vadd.f32 %v2703_v48, %v1611_v53  ;;  %v1620_v9 = vpop.f32.mrf.mxu0 }
 0x23d   : > { %v1713_v39 = vsel %vm1681_vm13, %v1665_v34, %v1697_v36  ;;  %v1667_v40 = vadd.f32 %v2703_v48, %v1626_v61  ;;  %v1621_v41 = vadd.f32 %v1620_v9, %v1427_v25 }
 0x23e   : > { %1730 = vst.msk [vmem:[%s2710_s18 + $0x48] sm:$0xff] %vm1720_vm5, %v1713_v39  ;;  %vm1680_vm14 = vcmp.gt.f32.partialorder %v1664_v1, 0.0  ;;  %v1696_v42 = vmul.f32 0.2, %v1664_v1  ;;  %v2082_v43 = vpop.f32.mrf.mxu0 }
 0x23f   : > { %vm1683_vm15 = vcmp.gt.f32.partialorder %v1667_v40, 0.0  ;;  %v1699_v46 = vmul.f32 0.2, %v1667_v40  ;;  %v1666_v49 = vadd.f32 %v2703_v48, %v1621_v41  ;;  %v1636_v23 = vadd.f32 %v2082_v43, %v2050_v13 }
 0x240   : > { %v1712_v50 = vsel %vm1680_vm14, %v1664_v1, %v1696_v42  ;;  %v1630_v51 = vpop.f32.mrf.mxu0 }
 0x241   : > { %1729 = vst.msk [vmem:[%s2710_s18 + $0x40] sm:$0xff] %vm1720_vm5, %v1712_v50  ;;  %v1715_v54 = vsel %vm1683_vm15, %v1667_v40, %v1699_v46  ;;  %vm1682_vm0 = vcmp.gt.f32.partialorder %v1666_v49, 0.0  ;;  %v1698_v56 = vmul.f32 0.2, %v1666_v49  ;;  %v1669_v20 = vadd.f32 %v2703_v48, %v1636_v23 }
 0x242   : > { %1732 = vst.msk [vmem:[%s2710_s18 + $0x58] sm:$0xff] %vm1720_vm5, %v1715_v54  ;;  %v1631_v30 = vadd.f32 %v1630_v51, %v1437_v38  ;;  %v2085_v55 = vpop.f32.mrf.mxu0 }
 0x243   : > { %v1714_v57 = vsel %vm1682_vm0, %v1666_v49, %v1698_v56  ;;  %vm1685_vm2 = vcmp.gt.f32.partialorder %v1669_v20, 0.0  ;;  %v1701_v58 = vmul.f32 0.2, %v1669_v20  ;;  %v1646_v21 = vadd.f32 %v2085_v55, %v2053_v6 }
 0x244   : > { %1731 = vst.msk [vmem:[%s2710_s18 + $0x50] sm:$0xff] %vm1720_vm5, %v1714_v57  ;;  %v1668_v60 = vadd.f32 %v2703_v48, %v1631_v30  ;;  %v1640_v62 = vpop.f32.mrf.mxu0 }
 0x245   : > { %v1717_v63 = vsel %vm1685_vm2, %v1669_v20, %v1701_v58  ;;  %v1671_v37 = vadd.f32 %v2703_v48, %v1646_v21  ;;  %v1641_v0 = vadd.f32 %v1640_v62, %v1447_v59 }
 0x246   : > { %1734 = vst.msk [vmem:[%s2710_s18 + $0x68] sm:$0xff] %vm1720_vm5, %v1717_v63  ;;  %vm1684_vm3 = vcmp.gt.f32.partialorder %v1668_v60, 0.0  ;;  %v1700_v52 = vmul.f32 0.2, %v1668_v60 }
 0x247   : > { %vm1687_vm4 = vcmp.gt.f32.partialorder %v1671_v37, 0.0  ;;  %v1703_v2 = vmul.f32 0.2, %v1671_v37  ;;  %v1670_v3 = vadd.f32 %v2703_v48, %v1641_v0 }
 0x248   : > { %v1716_v5 = vsel %vm1684_vm3, %v1668_v60, %v1700_v52 }
 0x249   : > { %1733 = vst.msk [vmem:[%s2710_s18 + $0x60] sm:$0xff] %vm1720_vm5, %v1716_v5  ;;  %v1719_v7 = vsel %vm1687_vm4, %v1671_v37, %v1703_v2  ;;  %vm1686_vm1 = vcmp.gt.f32.partialorder %v1670_v3, 0.0  ;;  %v1702_v12 = vmul.f32 0.2, %v1670_v3 }
 0x24a   : > { %1736 = vst.msk [vmem:[%s2710_s18 + $0x78] sm:$0xff] %vm1720_vm5, %v1719_v7 }
 0x24b   : > { %v1718_v4 = vsel %vm1686_vm1, %v1670_v3, %v1702_v12 }
 0x24c   : > { %1735 = vst.msk [vmem:[%s2710_s18 + $0x70] sm:$0xff] %vm1720_vm5, %v1718_v4 }
 0x24d PF: > { %s24_s17 = sadd.s32 1, %s2167_s17  }
 0x24e   : > { %p21_p4 = scmp.ge.s32.totalorder %s24_s17, 4  }
 0x250   :  { %23 = sbr.rel (!%p21_p4) target bundleno = 3 (0x3), region = 93 }

</bundles_post_ra>
